<compile_context>
chip_gen: v7x
topology: tpu7x:2x2x1
jax: 0.10.0
libtpu: 0.0.40
codegen_flags: <defaults>
</compile_context>

<pallas_src>
import functools

import jax
import jax.numpy as jnp
import numpy as np
from jax.experimental import pallas as pl
from jax.experimental.pallas import tpu as pltpu


def _round_up(n: int, m: int) -> int:
    return (n + m - 1) // m * m


def _cdiv(a: int, b: int) -> int:
    return -(-a // b)


def rnn_tanh_chunk_kernel(xp_ref, whh_hbm, out_ref, w_vmem, h_scr, dma_sem,
                          *, chunk: int, mxu_dtype):
    """One grid step = `chunk` timesteps of the tanh recurrence for one batch block.

    xp_ref : (chunk, Bc, Hp)  precomputed x_t @ W_ih^T + (b_ih + b_hh), time-major
    whh_hbm: (Hp, Hp)         W_hh^T left in HBM (memory_space=pl.ANY)
    out_ref: (Bc, chunk, Hp)  per-step hidden states, batch-major (batch_first)
    w_vmem : (Hp, Hp)         single resident VMEM copy of W_hh^T
    h_scr  : (Bc, Hp) f32     hidden state carried across time chunks
    dma_sem: DMA semaphore for the one-shot weight copy
    """
    # Start of each batch-block sweep: copy the recurrent weight into VMEM once
    # (single-buffered) and reset the carried hidden state.
    @pl.when(pl.program_id(1) == 0)
    def _():
        cp = pltpu.make_async_copy(whh_hbm, w_vmem, dma_sem)
        cp.start()
        cp.wait()
        h_scr[...] = jnp.zeros_like(h_scr)

    h = h_scr[...]  # f32 carried state
    for j in range(chunk):  # static full unroll; chunk is capped by Hp in the wrapper
        # MXU matmul in mxu_dtype (bf16-native if requested), f32 accumulation;
        # weight read inside the dot so it streams from VMEM (no hoisted value).
        z = xp_ref[j].astype(jnp.float32) + jnp.dot(
            h.astype(mxu_dtype), w_vmem[...],
            preferred_element_type=jnp.float32)
        h = jnp.tanh(z)
        # Batch-major store (lane-dense: Hp % 128 == 0). The sublane-strided
        # scatter is off the serial matmul->tanh chain and removes the
        # whole-array batch-first transpose (a full extra HBM pass) the wrapper
        # previously performed.
        out_ref[:, j, :] = h.astype(out_ref.dtype)
    h_scr[...] = h


def rnn_encoder_forward(x, w_ih, w_hh, b_ih, b_hh, *, chunk: int = 128,
                        mxu_dtype=None, batch_chunks=None):
    """Single-layer unidirectional tanh RNN (torch.nn.RNN, batch_first=True).

    x: (B, T, I); w_ih: (H, I); w_hh: (H, H); b_ih, b_hh: (H,)
    Returns (output (B, T, H), h_n (1, B, H)).
    """
    B, T, I = x.shape
    H = w_hh.shape[0]
    out_dtype = x.dtype

    if B == 0 or T == 0:  # empty batch / empty sequence guard
        return (jnp.zeros((B, T, H), out_dtype), jnp.zeros((1, B, H), out_dtype))

    # MXU / streamed-activation dtype. Default keeps the input dtype (f32 parity
    # with PyTorch); pass jnp.bfloat16 on v6e/v7x to halve weight VMEM + DMA.
    if mxu_dtype is None:
        mxu_dtype = x.dtype
    xp_dtype = mxu_dtype

    # ---- Tile sizes: batch -> sublane(8), hidden -> lane(128). Keep Hp at 128
    #      multiples (do NOT inflate toward 256: the recurrence is latency-bound).
    Bp = _round_up(B, 8)
    Hp = _round_up(H, 128)

    # ---- Batch blocks: use the second TensorCore on v7x (independent rows).
    if batch_chunks is None:
        batch_chunks = 1
        try:
            kind = jax.devices()[0].device_kind.lower()
            if ("v7" in kind or "7x" in kind) and Bp >= 16 and Bp % 16 == 0:
                batch_chunks = 2
        except Exception:
            batch_chunks = 1
    nB = max(1, int(batch_chunks))
    if Bp % (8 * nB) != 0:
        nB = 1
    Bc = Bp // nB

    # ---- Time chunk: cap the unrolled body count by Hp, then balance so the
    #      padded tail (wasted serial steps) is small.
    unroll_cap = max(8, _round_up(16384 // Hp, 8))
    tt = max(1, min(chunk, T, unroll_cap))
    if tt >= T:
        tt, nT = T, 1
    else:
        nT = _cdiv(T, tt)
        tt = _round_up(_cdiv(T, nT), 8)   # balance chunks -> tail waste <= 8*nT
        nT = _cdiv(T, tt)

    # ---- VMEM budget derived from the actual working set.
    isz = lambda dt: np.dtype(dt).itemsize
    headroom = 4 * 1024 * 1024
    try:
        phys_vmem = int(pltpu.get_tpu_info().vmem_capacity_bytes)
    except Exception:
        phys_vmem = 64 * 1024 * 1024  # conservative (v7x per-core VMEM)
    budget = int(phys_vmem * 0.85)

    def _vmem_need(tt_):
        return (2 * tt_ * Bc * Hp * isz(xp_dtype)      # xproj chunk, double-buffered
                + 2 * Bc * tt_ * Hp * isz(out_dtype)   # output chunk, double-buffered
                + Hp * Hp * isz(mxu_dtype)             # resident W_hh^T, single copy
                + Bc * Hp * 4)                         # carried h (f32)

    while _vmem_need(tt) + headroom > budget and tt > 8:
        tt = max(8, (tt // 2) // 8 * 8)
        nT = _cdiv(T, tt)
    Tp = nT * tt
    vmem_limit = int(min(max(_vmem_need(tt) + headroom, 16 * 1024 * 1024),
                         max(phys_vmem - 2 * 1024 * 1024, 16 * 1024 * 1024)))

    # ---- Hoisted, embarrassingly-parallel input projection. Pad only the small
    #      operands (x along B/T, weights along H) so xproj is born time-major
    #      and Hp-wide — no extra pad pass over the big (Tp,Bp,Hp) stream.
    x_p = x
    if Bp != B or Tp != T:
        x_p = jnp.pad(x, ((0, Bp - B), (0, Tp - T), (0, 0)))
    w_ih_p = w_ih if Hp == H else jnp.pad(w_ih, ((0, Hp - H), (0, 0)))
    bias = (b_ih + b_hh).astype(jnp.float32)
    bias_p = bias if Hp == H else jnp.pad(bias, (0, Hp - H))
    whh_t = w_hh.T
    whh_t_p = whh_t if Hp == H else jnp.pad(whh_t, ((0, Hp - H), (0, Hp - H)))
    whh_t_p = whh_t_p.astype(mxu_dtype)

    xproj = jnp.einsum("bti,hi->tbh", x_p, w_ih_p,
                       preferred_element_type=jnp.float32,
                       precision=jax.lax.Precision.HIGHEST) + bias_p
    xproj = xproj.astype(xp_dtype)  # (Tp, Bp, Hp), time-major

    out_full = pl.pallas_call(
        functools.partial(rnn_tanh_chunk_kernel, chunk=tt, mxu_dtype=mxu_dtype),
        out_shape=jax.ShapeDtypeStruct((Bp, Tp, Hp), out_dtype),
        grid_spec=pltpu.PrefetchScalarGridSpec(
            num_scalar_prefetch=0,
            grid=(nB, nT),
            in_specs=[
                pl.BlockSpec((tt, Bc, Hp), lambda b, c: (c, b, 0)),  # xproj chunk
                pl.BlockSpec(memory_space=pl.ANY),                    # W_hh^T in HBM
            ],
            out_specs=pl.BlockSpec((Bc, tt, Hp), lambda b, c: (b, c, 0)),
            scratch_shapes=[
                pltpu.VMEM((Hp, Hp), mxu_dtype),        # resident weight (1 copy)
                pltpu.VMEM((Bc, Hp), jnp.float32),      # carried hidden state
                pltpu.SemaphoreType.DMA(()),            # weight-copy semaphore
            ],
        ),
        compiler_params=pltpu.CompilerParams(
            dimension_semantics=("parallel", "arbitrary"),  # batch parallel, time serial
            vmem_limit_bytes=vmem_limit,
        ),
    )(xproj, whh_t_p)

    out = out_full[:B, :T, :H]            # (B, T, H), already batch_first
    h_n = out_full[:B, T - 1, :H][None]   # (1, B, H) — last real timestep
    return out, h_n


def reference_rnn(x, w_ih, w_hh, b_ih, b_hh):
    """Pure-JAX reference matching torch.nn.RNN (tanh, 1 layer, batch_first)."""
    B, T, I = x.shape
    H = w_hh.shape[0]
    h0 = jnp.zeros((B, H), jnp.float32)

    def step(h, x_t):
        h_new = jnp.tanh(x_t @ w_ih.T + b_ih + h @ w_hh.T + b_hh)
        return h_new, h_new

    h_last, ys = jax.lax.scan(step, h0, jnp.transpose(x, (1, 0, 2)))
    return jnp.transpose(ys, (1, 0, 2)), h_last[None]


if __name__ == "__main__":
    key = jax.random.PRNGKey(0)
    B, T, I, H = 2, 8, 16, 32   # batch, seq, input_size, hidden_size

    kx, k1, k2, k3, k4 = jax.random.split(key, 5)
    x = jax.random.normal(kx, (B, T, I), dtype=jnp.float32)

    # PyTorch nn.RNN default init: U(-1/sqrt(H), 1/sqrt(H)), deterministic here.
    bound = 1.0 / float(np.sqrt(H))
    w_ih = jax.random.uniform(k1, (H, I), jnp.float32, -bound, bound)
    w_hh = jax.random.uniform(k2, (H, H), jnp.float32, -bound, bound)
    b_ih = jax.random.uniform(k3, (H,), jnp.float32, -bound, bound)
    b_hh = jax.random.uniform(k4, (H,), jnp.float32, -bound, bound)

    out, h_n = jax.jit(rnn_encoder_forward)(x, w_ih, w_hh, b_ih, b_hh)
    out = jax.block_until_ready(out)
    h_n = jax.block_until_ready(h_n)

    out_ref, hn_ref = reference_rnn(x, w_ih, w_hh, b_ih, b_hh)
    np.testing.assert_allclose(np.asarray(out), np.asarray(out_ref),
                               rtol=1e-5, atol=1e-5)
    np.testing.assert_allclose(np.asarray(h_n), np.asarray(hn_ref),
                               rtol=1e-5, atol=1e-5)

    assert out.shape == (B, T, H) and h_n.shape == (1, B, H)
    print("KERNEL_OK")
</pallas_src>

<mosaic_0001>
module attributes {stable_mosaic.version = 11 : i64} {
  func.func @rnn_tanh_chunk_kernel(%arg0: i32, %arg1: i32, %arg2: memref<8x8x128xf32, #tpu.memory_space<vmem>>, %arg3: memref<128x128xf32, #tpu.memory_space<any>>, %arg4: memref<8x8x128xf32, #tpu.memory_space<vmem>>, %arg5: memref<128x128xf32, #tpu.memory_space<vmem>>, %arg6: memref<8x128xf32, #tpu.memory_space<vmem>>, %arg7: memref<!tpu.dma_semaphore, #tpu.memory_space<semaphore_mem>>) attributes {dimension_semantics = [#tpu.dimension_semantics<parallel>, #tpu.dimension_semantics<arbitrary>], iteration_bounds = array<i64: 1, 1>, scalar_prefetch = 0 : i64, scratch_operands = 3 : i64, tpu.core_type = #tpu.core_type<tc>, window_params = [{transform_indices = @transform_0, window_bounds = array<i64: 8, 8, 128>}, {}, {transform_indices = @transform_2, window_bounds = array<i64: 8, 8, 128>}]} {
    %c0_i32 = arith.constant 0 : i32
    %0 = arith.cmpi eq, %arg1, %c0_i32 : i32
    %1 = arith.extui %0 : i1 to i32
    %c0_i32_0 = arith.constant 0 : i32
    %2 = arith.cmpi ne, %1, %c0_i32_0 : i32
    scf.if %2 {
      tpu.enqueue_dma source(%arg3 : memref<128x128xf32, #tpu.memory_space<any>>) target(%arg5 : memref<128x128xf32, #tpu.memory_space<vmem>>) target_semaphore(%arg7 : memref<!tpu.dma_semaphore, #tpu.memory_space<semaphore_mem>>)
      tpu.wait_dma2 semaphore(%arg7 : memref<!tpu.dma_semaphore, #tpu.memory_space<semaphore_mem>>) src(%arg3 : memref<128x128xf32, #tpu.memory_space<any>>) dst(%arg5 : memref<128x128xf32, #tpu.memory_space<vmem>>)
      %cst_68 = arith.constant 0.000000e+00 : f32
      %77 = vector.broadcast %cst_68 : f32 to vector<8x128xf32>
      %c0_69 = arith.constant 0 : index
      %c0_70 = arith.constant 0 : index
      %78 = vector.load %arg6[%c0_69, %c0_70] : memref<8x128xf32, #tpu.memory_space<vmem>>, vector<8x128xf32>
      tpu.vector_store %arg6[%c0_69, %c0_70], %77 {strides = array<i32>} : memref<8x128xf32, #tpu.memory_space<vmem>>, vector<8x128xf32>,
    } else {
    }
    %c0 = arith.constant 0 : index
    %c0_1 = arith.constant 0 : index
    %3 = vector.load %arg6[%c0, %c0_1] : memref<8x128xf32, #tpu.memory_space<vmem>>, vector<8x128xf32>
    %c0_2 = arith.constant 0 : index
    %c0_3 = arith.constant 0 : index
    %c0_4 = arith.constant 0 : index
    %4 = vector.load %arg2[%c0_2, %c0_3, %c0_4] : memref<8x8x128xf32, #tpu.memory_space<vmem>>, vector<1x8x128xf32>
    %5 = vector.shape_cast %4 : vector<1x8x128xf32> to vector<8x128xf32>
    %c0_5 = arith.constant 0 : index
    %c0_6 = arith.constant 0 : index
    %6 = vector.load %arg5[%c0_5, %c0_6] : memref<128x128xf32, #tpu.memory_space<vmem>>, vector<128x128xf32>
    %cst = arith.constant dense<0.000000e+00> : vector<8x128xf32>
    %7 = tpu.matmul %3, %6, %cst {dimension_numbers = #tpu.dot_dimension_numbers<[1], [0], [0], [1], [0, 0, 1, 1], [], []>} : vector<8x128xf32>, vector<128x128xf32>, vector<8x128xf32> -> vector<8x128xf32>
    %8 = arith.addf %5, %7 : vector<8x128xf32>
    %9 = math.tanh %8 : vector<8x128xf32>
    %c0_7 = arith.constant 0 : index
    %c0_8 = arith.constant 0 : index
    %c0_9 = arith.constant 0 : index
    %10 = vector.load %arg4[%c0_7, %c0_8, %c0_9] : memref<8x8x128xf32, #tpu.memory_space<vmem>>, vector<8x1x128xf32>
    %11 = vector.shape_cast %10 : vector<8x1x128xf32> to vector<8x128xf32>
    %12 = vector.shape_cast %9 : vector<8x128xf32> to vector<8x1x128xf32>
    tpu.vector_store %arg4[%c0_7, %c0_8, %c0_9], %12 {strides = array<i32>} : memref<8x8x128xf32, #tpu.memory_space<vmem>>, vector<8x1x128xf32>,
    %c1 = arith.constant 1 : index
    %c0_10 = arith.constant 0 : index
    %c0_11 = arith.constant 0 : index
    %13 = vector.load %arg2[%c1, %c0_10, %c0_11] : memref<8x8x128xf32, #tpu.memory_space<vmem>>, vector<1x8x128xf32>
    %14 = vector.shape_cast %13 : vector<1x8x128xf32> to vector<8x128xf32>
    %c0_12 = arith.constant 0 : index
    %c0_13 = arith.constant 0 : index
    %15 = vector.load %arg5[%c0_12, %c0_13] : memref<128x128xf32, #tpu.memory_space<vmem>>, vector<128x128xf32>
    %cst_14 = arith.constant dense<0.000000e+00> : vector<8x128xf32>
    %16 = tpu.matmul %9, %15, %cst_14 {dimension_numbers = #tpu.dot_dimension_numbers<[1], [0], [0], [1], [0, 0, 1, 1], [], []>} : vector<8x128xf32>, vector<128x128xf32>, vector<8x128xf32> -> vector<8x128xf32>
    %17 = arith.addf %14, %16 : vector<8x128xf32>
    %18 = math.tanh %17 : vector<8x128xf32>
    %c0_15 = arith.constant 0 : index
    %c1_16 = arith.constant 1 : index
    %c0_17 = arith.constant 0 : index
    %19 = vector.load %arg4[%c0_15, %c1_16, %c0_17] : memref<8x8x128xf32, #tpu.memory_space<vmem>>, vector<8x1x128xf32>
    %20 = vector.shape_cast %19 : vector<8x1x128xf32> to vector<8x128xf32>
    %21 = vector.shape_cast %18 : vector<8x128xf32> to vector<8x1x128xf32>
    tpu.vector_store %arg4[%c0_15, %c1_16, %c0_17], %21 {strides = array<i32>} : memref<8x8x128xf32, #tpu.memory_space<vmem>>, vector<8x1x128xf32>,
    %c2 = arith.constant 2 : index
    %c0_18 = arith.constant 0 : index
    %c0_19 = arith.constant 0 : index
    %22 = vector.load %arg2[%c2, %c0_18, %c0_19] : memref<8x8x128xf32, #tpu.memory_space<vmem>>, vector<1x8x128xf32>
    %23 = vector.shape_cast %22 : vector<1x8x128xf32> to vector<8x128xf32>
    %c0_20 = arith.constant 0 : index
    %c0_21 = arith.constant 0 : index
    %24 = vector.load %arg5[%c0_20, %c0_21] : memref<128x128xf32, #tpu.memory_space<vmem>>, vector<128x128xf32>
    %cst_22 = arith.constant dense<0.000000e+00> : vector<8x128xf32>
    %25 = tpu.matmul %18, %24, %cst_22 {dimension_numbers = #tpu.dot_dimension_numbers<[1], [0], [0], [1], [0, 0, 1, 1], [], []>} : vector<8x128xf32>, vector<128x128xf32>, vector<8x128xf32> -> vector<8x128xf32>
    %26 = arith.addf %23, %25 : vector<8x128xf32>
    %27 = math.tanh %26 : vector<8x128xf32>
    %c0_23 = arith.constant 0 : index
    %c2_24 = arith.constant 2 : index
    %c0_25 = arith.constant 0 : index
    %28 = vector.load %arg4[%c0_23, %c2_24, %c0_25] : memref<8x8x128xf32, #tpu.memory_space<vmem>>, vector<8x1x128xf32>
    %29 = vector.shape_cast %28 : vector<8x1x128xf32> to vector<8x128xf32>
    %30 = vector.shape_cast %27 : vector<8x128xf32> to vector<8x1x128xf32>
    tpu.vector_store %arg4[%c0_23, %c2_24, %c0_25], %30 {strides = array<i32>} : memref<8x8x128xf32, #tpu.memory_space<vmem>>, vector<8x1x128xf32>,
    %c3 = arith.constant 3 : index
    %c0_26 = arith.constant 0 : index
    %c0_27 = arith.constant 0 : index
    %31 = vector.load %arg2[%c3, %c0_26, %c0_27] : memref<8x8x128xf32, #tpu.memory_space<vmem>>, vector<1x8x128xf32>
    %32 = vector.shape_cast %31 : vector<1x8x128xf32> to vector<8x128xf32>
    %c0_28 = arith.constant 0 : index
    %c0_29 = arith.constant 0 : index
    %33 = vector.load %arg5[%c0_28, %c0_29] : memref<128x128xf32, #tpu.memory_space<vmem>>, vector<128x128xf32>
    %cst_30 = arith.constant dense<0.000000e+00> : vector<8x128xf32>
    %34 = tpu.matmul %27, %33, %cst_30 {dimension_numbers = #tpu.dot_dimension_numbers<[1], [0], [0], [1], [0, 0, 1, 1], [], []>} : vector<8x128xf32>, vector<128x128xf32>, vector<8x128xf32> -> vector<8x128xf32>
    %35 = arith.addf %32, %34 : vector<8x128xf32>
    %36 = math.tanh %35 : vector<8x128xf32>
    %c0_31 = arith.constant 0 : index
    %c3_32 = arith.constant 3 : index
    %c0_33 = arith.constant 0 : index
    %37 = vector.load %arg4[%c0_31, %c3_32, %c0_33] : memref<8x8x128xf32, #tpu.memory_space<vmem>>, vector<8x1x128xf32>
    %38 = vector.shape_cast %37 : vector<8x1x128xf32> to vector<8x128xf32>
    %39 = vector.shape_cast %36 : vector<8x128xf32> to vector<8x1x128xf32>
    tpu.vector_store %arg4[%c0_31, %c3_32, %c0_33], %39 {strides = array<i32>} : memref<8x8x128xf32, #tpu.memory_space<vmem>>, vector<8x1x128xf32>,
    %c4 = arith.constant 4 : index
    %c0_34 = arith.constant 0 : index
    %c0_35 = arith.constant 0 : index
    %40 = vector.load %arg2[%c4, %c0_34, %c0_35] : memref<8x8x128xf32, #tpu.memory_space<vmem>>, vector<1x8x128xf32>
    %41 = vector.shape_cast %40 : vector<1x8x128xf32> to vector<8x128xf32>
    %c0_36 = arith.constant 0 : index
    %c0_37 = arith.constant 0 : index
    %42 = vector.load %arg5[%c0_36, %c0_37] : memref<128x128xf32, #tpu.memory_space<vmem>>, vector<128x128xf32>
    %cst_38 = arith.constant dense<0.000000e+00> : vector<8x128xf32>
    %43 = tpu.matmul %36, %42, %cst_38 {dimension_numbers = #tpu.dot_dimension_numbers<[1], [0], [0], [1], [0, 0, 1, 1], [], []>} : vector<8x128xf32>, vector<128x128xf32>, vector<8x128xf32> -> vector<8x128xf32>
    %44 = arith.addf %41, %43 : vector<8x128xf32>
    %45 = math.tanh %44 : vector<8x128xf32>
    %c0_39 = arith.constant 0 : index
    %c4_40 = arith.constant 4 : index
    %c0_41 = arith.constant 0 : index
    %46 = vector.load %arg4[%c0_39, %c4_40, %c0_41] : memref<8x8x128xf32, #tpu.memory_space<vmem>>, vector<8x1x128xf32>
    %47 = vector.shape_cast %46 : vector<8x1x128xf32> to vector<8x128xf32>
    %48 = vector.shape_cast %45 : vector<8x128xf32> to vector<8x1x128xf32>
    tpu.vector_store %arg4[%c0_39, %c4_40, %c0_41], %48 {strides = array<i32>} : memref<8x8x128xf32, #tpu.memory_space<vmem>>, vector<8x1x128xf32>,
    %c5 = arith.constant 5 : index
    %c0_42 = arith.constant 0 : index
    %c0_43 = arith.constant 0 : index
    %49 = vector.load %arg2[%c5, %c0_42, %c0_43] : memref<8x8x128xf32, #tpu.memory_space<vmem>>, vector<1x8x128xf32>
    %50 = vector.shape_cast %49 : vector<1x8x128xf32> to vector<8x128xf32>
    %c0_44 = arith.constant 0 : index
    %c0_45 = arith.constant 0 : index
    %51 = vector.load %arg5[%c0_44, %c0_45] : memref<128x128xf32, #tpu.memory_space<vmem>>, vector<128x128xf32>
    %cst_46 = arith.constant dense<0.000000e+00> : vector<8x128xf32>
    %52 = tpu.matmul %45, %51, %cst_46 {dimension_numbers = #tpu.dot_dimension_numbers<[1], [0], [0], [1], [0, 0, 1, 1], [], []>} : vector<8x128xf32>, vector<128x128xf32>, vector<8x128xf32> -> vector<8x128xf32>
    %53 = arith.addf %50, %52 : vector<8x128xf32>
    %54 = math.tanh %53 : vector<8x128xf32>
    %c0_47 = arith.constant 0 : index
    %c5_48 = arith.constant 5 : index
    %c0_49 = arith.constant 0 : index
    %55 = vector.load %arg4[%c0_47, %c5_48, %c0_49] : memref<8x8x128xf32, #tpu.memory_space<vmem>>, vector<8x1x128xf32>
    %56 = vector.shape_cast %55 : vector<8x1x128xf32> to vector<8x128xf32>
    %57 = vector.shape_cast %54 : vector<8x128xf32> to vector<8x1x128xf32>
    tpu.vector_store %arg4[%c0_47, %c5_48, %c0_49], %57 {strides = array<i32>} : memref<8x8x128xf32, #tpu.memory_space<vmem>>, vector<8x1x128xf32>,
    %c6 = arith.constant 6 : index
    %c0_50 = arith.constant 0 : index
    %c0_51 = arith.constant 0 : index
    %58 = vector.load %arg2[%c6, %c0_50, %c0_51] : memref<8x8x128xf32, #tpu.memory_space<vmem>>, vector<1x8x128xf32>
    %59 = vector.shape_cast %58 : vector<1x8x128xf32> to vector<8x128xf32>
    %c0_52 = arith.constant 0 : index
    %c0_53 = arith.constant 0 : index
    %60 = vector.load %arg5[%c0_52, %c0_53] : memref<128x128xf32, #tpu.memory_space<vmem>>, vector<128x128xf32>
    %cst_54 = arith.constant dense<0.000000e+00> : vector<8x128xf32>
    %61 = tpu.matmul %54, %60, %cst_54 {dimension_numbers = #tpu.dot_dimension_numbers<[1], [0], [0], [1], [0, 0, 1, 1], [], []>} : vector<8x128xf32>, vector<128x128xf32>, vector<8x128xf32> -> vector<8x128xf32>
    %62 = arith.addf %59, %61 : vector<8x128xf32>
    %63 = math.tanh %62 : vector<8x128xf32>
    %c0_55 = arith.constant 0 : index
    %c6_56 = arith.constant 6 : index
    %c0_57 = arith.constant 0 : index
    %64 = vector.load %arg4[%c0_55, %c6_56, %c0_57] : memref<8x8x128xf32, #tpu.memory_space<vmem>>, vector<8x1x128xf32>
    %65 = vector.shape_cast %64 : vector<8x1x128xf32> to vector<8x128xf32>
    %66 = vector.shape_cast %63 : vector<8x128xf32> to vector<8x1x128xf32>
    tpu.vector_store %arg4[%c0_55, %c6_56, %c0_57], %66 {strides = array<i32>} : memref<8x8x128xf32, #tpu.memory_space<vmem>>, vector<8x1x128xf32>,
    %c7 = arith.constant 7 : index
    %c0_58 = arith.constant 0 : index
    %c0_59 = arith.constant 0 : index
    %67 = vector.load %arg2[%c7, %c0_58, %c0_59] : memref<8x8x128xf32, #tpu.memory_space<vmem>>, vector<1x8x128xf32>
    %68 = vector.shape_cast %67 : vector<1x8x128xf32> to vector<8x128xf32>
    %c0_60 = arith.constant 0 : index
    %c0_61 = arith.constant 0 : index
    %69 = vector.load %arg5[%c0_60, %c0_61] : memref<128x128xf32, #tpu.memory_space<vmem>>, vector<128x128xf32>
    %cst_62 = arith.constant dense<0.000000e+00> : vector<8x128xf32>
    %70 = tpu.matmul %63, %69, %cst_62 {dimension_numbers = #tpu.dot_dimension_numbers<[1], [0], [0], [1], [0, 0, 1, 1], [], []>} : vector<8x128xf32>, vector<128x128xf32>, vector<8x128xf32> -> vector<8x128xf32>
    %71 = arith.addf %68, %70 : vector<8x128xf32>
    %72 = math.tanh %71 : vector<8x128xf32>
    %c0_63 = arith.constant 0 : index
    %c7_64 = arith.constant 7 : index
    %c0_65 = arith.constant 0 : index
    %73 = vector.load %arg4[%c0_63, %c7_64, %c0_65] : memref<8x8x128xf32, #tpu.memory_space<vmem>>, vector<8x1x128xf32>
    %74 = vector.shape_cast %73 : vector<8x1x128xf32> to vector<8x128xf32>
    %75 = vector.shape_cast %72 : vector<8x128xf32> to vector<8x1x128xf32>
    tpu.vector_store %arg4[%c0_63, %c7_64, %c0_65], %75 {strides = array<i32>} : memref<8x8x128xf32, #tpu.memory_space<vmem>>, vector<8x1x128xf32>,
    %c0_66 = arith.constant 0 : index
    %c0_67 = arith.constant 0 : index
    %76 = vector.load %arg6[%c0_66, %c0_67] : memref<8x128xf32, #tpu.memory_space<vmem>>, vector<8x128xf32>
    tpu.vector_store %arg6[%c0_66, %c0_67], %72 {strides = array<i32>} : memref<8x128xf32, #tpu.memory_space<vmem>>, vector<8x128xf32>,
    return
  }
  func.func @transform_0(%arg0: i32, %arg1: i32) -> (i32, i32, i32) {
    %c0_i32 = arith.constant 0 : i32
    %c0_i32_0 = arith.constant 0 : i32
    return %arg1, %arg0, %c0_i32 : i32, i32, i32
  }
  func.func @transform_2(%arg0: i32, %arg1: i32) -> (i32, i32, i32) {
    %c0_i32 = arith.constant 0 : i32
    %c0_i32_0 = arith.constant 0 : i32
    return %arg0, %arg1, %c0_i32 : i32, i32, i32
  }
}

</mosaic_0001>

<bundles_post_ra>
// kernel: rnn_encoder_forward.1
= control target key start
LH: loop header
LB: loop body
LE: loop exit
PB: predicated region body
PF: predicated region fallthrough
CT: control target
= control target key end

     0   :  { %s2520_s0 = inlined_call_operand.vmem [shape: f32[8,8,128], index: 0, kind: input, shape index: {}]   ;;  %s2521_s1 = inlined_call_operand.vmem [shape: f32[128,128], index: 1, kind: input, shape index: {}]   ;;  %s2522_s2 = inlined_call_operand.vmem [shape: f32[8,8,128], index: 2, kind: output, shape index: {}]  }
   0x1   :  { %v45_v0 = vld [vmem:[%s2521_s1] sm:$0xff]  ;;  %v47_v1 = vld [vmem:[%s2521_s1 + $0x8] sm:$0xff]  ;;  %v49_v2 = vld [vmem:[%s2521_s1 + $0x10] sm:$0xff] }
   0x2   :  { %v51_v3 = vld [vmem:[%s2521_s1 + $0x18] sm:$0xff]  ;;  %v53_v4 = vld [vmem:[%s2521_s1 + $0x20] sm:$0xff]  ;;  %v55_v5 = vld [vmem:[%s2521_s1 + $0x28] sm:$0xff] }
   0x3   :  { %v57_v6 = vld [vmem:[%s2521_s1 + $0x30] sm:$0xff]  ;;  %v59_v7 = vld [vmem:[%s2521_s1 + $0x38] sm:$0xff]  ;;  %v61_v8 = vld [vmem:[%s2521_s1 + $0x40] sm:$0xff] }
   0x4   :  { %v63_v9 = vld [vmem:[%s2521_s1 + $0x48] sm:$0xff]  ;;  %v65_v10 = vld [vmem:[%s2521_s1 + $0x50] sm:$0xff]  ;;  %v67_v11 = vld [vmem:[%s2521_s1 + $0x58] sm:$0xff] }
   0x5   :  { %v69_v12 = vld [vmem:[%s2521_s1 + $0x60] sm:$0xff]  ;;  %v71_v13 = vld [vmem:[%s2521_s1 + $0x68] sm:$0xff]  ;;  %v73_v14 = vld [vmem:[%s2521_s1 + $0x70] sm:$0xff] }
   0x6   :  { %v75_v15 = vld [vmem:[%s2521_s1 + $0x78] sm:$0xff] }
   0x7   :  { %84 = vsyncadd [#allocation4], 2048  ;;  %v2093_v16 = vpack.c.bf16 %v47_v1, %v45_v0 }
   0x8   :  { %2024 = dma.done.wait [#allocation4], 2048 }
   0x9   :  { %2025 = vsyncadd [#allocation4], 4294965248  ;;  %v2026_v17 = vmov 0.0|0.0   ;;  %v2097_v18 = vpack.c.bf16 %v51_v3, %v49_v2  ;;  %vm2027_vm0 = vmmov 0   ;;  %v2028_v19 = vmov 0.0   ;;  %v90_v26 = vld [vmem:[%s2520_s0] sm:$0xff] }
   0xa   :  { %1812 = vmatprep.subr.bf16.mxu0 %v2026_v17  ;;  %1836 = vmatprep.subr.bf16.mxu1 %v2026_v17  ;;  %v2108_v20 = vpack.c.bf16 %v55_v5, %v53_v4  ;;  %v2114_v21 = vpack.c.bf16 %v59_v7, %v57_v6  ;;  %v2120_v22 = vpack.c.bf16 %v63_v9, %v61_v8  ;;  %v2029_v30 = vmov 1966171168   ;;  %v1360_v50 = vld [vmem:[%s2520_s0 + $0x8] sm:$0xff]  ;;  %v1365_v4 = vld [vmem:[%s2520_s0 + $0x10] sm:$0xff] }
   0xb   :  { %1814 = vmatpush3.bf16.msra.mxu0 %v2093_v16  ;;  %1564 = vmatprep.mubr.msk.f32.mxu0 %vm2027_vm0, %v2028_v19  ;;  %v2126_v23 = vpack.c.bf16 %v67_v11, %v65_v10  ;;  %v2132_v24 = vpack.c.bf16 %v71_v13, %v69_v12  ;;  %v2138_v25 = vpack.c.bf16 %v75_v15, %v73_v14  ;;  %v182_v31 = vunpack.c.l.s4 %v2029_v30 }
   0xc   :  { %1815 = vmatprep.subr.bf16.mxu0 %v2026_v17  ;;  %1838 = vmatpush3.bf16.msra.mxu1 %v2093_v16  ;;  %v184_v32 = vlaneseq }
   0xd   :  { %1599 = vmatprep.mubr.msk.f32.mxu1 %vm2027_vm0, %v2028_v19  ;;  %1839 = vmatprep.subr.bf16.mxu1 %v2026_v17  ;;  %v183_v33 = vunpack.c.0.s8 %v182_v31 }
   0xe   :  { %v185_v34 = vshrl.u32 %v184_v32, 7  ;;  %v1370_v32 = vld [vmem:[%s2520_s0 + $0x18] sm:$0xff] }
   0xf   :  { %1817 = vmatpush3.bf16.msra.mxu0 %v2097_v18 }
  0x10   :  { %1818 = vmatprep.subr.bf16.mxu0 %v2026_v17  ;;  %1841 = vmatpush3.bf16.msra.mxu1 %v2097_v18  ;;  %v2169_v35 = vsub.s32 %v183_v33, %v185_v34 }
  0x11   :  { %1842 = vmatprep.subr.bf16.mxu1 %v2026_v17 }
  0x13   :  { %1820 = vmatpush3.bf16.msra.mxu0 %v2108_v20 }
  0x14   :  { %1821 = vmatprep.subr.bf16.mxu0 %v2026_v17  ;;  %1844 = vmatpush3.bf16.msra.mxu1 %v2108_v20 }
  0x15   :  { %1845 = vmatprep.subr.bf16.mxu1 %v2026_v17 }
  0x17   :  { %1823 = vmatpush3.bf16.msra.mxu0 %v2114_v21 }
  0x18   :  { %1824 = vmatprep.subr.bf16.mxu0 %v2026_v17  ;;  %1847 = vmatpush3.bf16.msra.mxu1 %v2114_v21 }
  0x19   :  { %1848 = vmatprep.subr.bf16.mxu1 %v2026_v17 }
  0x1b   :  { %1826 = vmatpush3.bf16.msra.mxu0 %v2120_v22 }
  0x1c   :  { %1827 = vmatprep.subr.bf16.mxu0 %v2026_v17  ;;  %1850 = vmatpush3.bf16.msra.mxu1 %v2120_v22 }
  0x1d   :  { %1851 = vmatprep.subr.bf16.mxu1 %v2026_v17 }
  0x1f   :  { %1829 = vmatpush3.bf16.msra.mxu0 %v2126_v23 }
  0x20   :  { %1830 = vmatprep.subr.bf16.mxu0 %v2026_v17  ;;  %1853 = vmatpush3.bf16.msra.mxu1 %v2126_v23 }
  0x21   :  { %1854 = vmatprep.subr.bf16.mxu1 %v2026_v17 }
  0x23   :  { %1832 = vmatpush3.bf16.msra.mxu0 %v2132_v24 }
  0x24   :  { %1833 = vmatprep.subr.bf16.mxu0 %v2026_v17  ;;  %1856 = vmatpush3.bf16.msra.mxu1 %v2132_v24 }
  0x25   :  { %1857 = vmatprep.subr.bf16.mxu1 %v2026_v17 }
  0x27   :  { %1835 = vmatpush3.bf16.msra.mxu0 %v2138_v25 }
  0x28   :  { %1860 = vmatprep.subr.bf16.mxu0 %v2026_v17  ;;  %1859 = vmatpush3.bf16.msra.mxu1 %v2138_v25 }
  0x29   :  { %1884 = vmatprep.subr.bf16.mxu1 %v2026_v17 }
  0x2a   :  { %1565 = vmatmul.mubr.f32.vlgmr.msra.gmra.mrb[0].mxu0 %v2028_v19 }
  0x2b   :  { %1862 = vmatpush3.bf16.msra.mxu0 %v2093_v16  ;;  %1634 = vmatprep.mubr.msk.f32.mxu0 %vm2027_vm0, %v2028_v19 }
  0x2c   :  { %1863 = vmatprep.subr.bf16.mxu0 %v2026_v17 }
  0x2f   :  { %1865 = vmatpush3.bf16.msra.mxu0 %v2097_v18 }
  0x30   :  { %1866 = vmatprep.subr.bf16.mxu0 %v2026_v17 }
  0x33   :  { %1868 = vmatpush3.bf16.msra.mxu0 %v2108_v20 }
  0x34   :  { %1869 = vmatprep.subr.bf16.mxu0 %v2026_v17 }
  0x37   :  { %1871 = vmatpush3.bf16.msra.mxu0 %v2114_v21 }
  0x38   :  { %1872 = vmatprep.subr.bf16.mxu0 %v2026_v17 }
  0x3b   :  { %1874 = vmatpush3.bf16.msra.mxu0 %v2120_v22 }
  0x3c   :  { %1875 = vmatprep.subr.bf16.mxu0 %v2026_v17 }
  0x3f   :  { %1877 = vmatpush3.bf16.msra.mxu0 %v2126_v23 }
  0x40   :  { %1878 = vmatprep.subr.bf16.mxu0 %v2026_v17 }
  0x43   :  { %1880 = vmatpush3.bf16.msra.mxu0 %v2132_v24 }
  0x44   :  { %1881 = vmatprep.subr.bf16.mxu0 %v2026_v17 }
  0x47   :  { %1883 = vmatpush3.bf16.msra.mxu0 %v2138_v25 }
  0x48   :  { %1908 = vmatprep.subr.bf16.mxu0 %v2026_v17 }
  0xfd   :  { %v173_v27 = vpop.f32.mrb[0].mxu0 }
  0xfe   :  { %v177_v28 = vadd.f32 %v173_v27, %v90_v26  ;;  %v1566_v29 = vpop.f32.mrb[1].mxu0 }
 0x100   :  { %2008 = vtanh.f32 %v177_v28 }
 0x10a   :  { %v2009_v36 = vpop.eup %2008 }
 0x10b   :  { %v180_v37 = vcombine.high %v2009_v36, %v2009_v36  ;;  %v187_v38 = vrot.slane %v2009_v36, %v2169_v35  ;;  %1600 = vmatmul.mubr.f32.vlgmr.msra.gmra.mrb[0].mxu1 %v2009_v36 }
 0x10c   :  { %1886 = vmatpush3.bf16.msra.mxu1 %v2093_v16  ;;  %1669 = vmatprep.mubr.msk.f32.mxu1 %vm2027_vm0, %v2028_v19 }
 0x10d   :  { %v194_v39 = vrot.slane %v180_v37, %v2169_v35  ;;  %v195_v40 = vcombine.high %v187_v38, %v187_v38  ;;  %v203_v41 = vrot.slane %v187_v38, %v2169_v35  ;;  %1356 = vst.sshfl [vmem:[%s2522_s2] sm:$0x1 pattern:$0x73625140] %v187_v38  ;;  %1887 = vmatprep.subr.bf16.mxu1 %v2026_v17 }
 0x10f   :  { %v196_v42 = vcombine.high %v194_v39, %v194_v39  ;;  %v210_v43 = vrot.slane %v194_v39, %v2169_v35  ;;  %v217_v44 = vrot.slane %v195_v40, %v2169_v35  ;;  %v225_v45 = vcombine.high %v203_v41, %v203_v41  ;;  %1357 = vst.sshfl [vmem:[%s2522_s2 + $0x8] sm:$0x1 pattern:$0x73625140] %v195_v40 }
 0x110   :  { %1358 = vst.sshfl [vmem:[%s2522_s2 + $0x20] sm:$0x1 pattern:$0x73625140] %v194_v39  ;;  %1889 = vmatpush3.bf16.msra.mxu1 %v2097_v18 }
 0x111   :  { %v224_v46 = vrot.slane %v196_v42, %v2169_v35  ;;  %v226_v47 = vcombine.high %v210_v43, %v210_v43  ;;  %v227_v48 = vcombine.high %v217_v44, %v217_v44  ;;  %239 = vst [vmem:[%s2522_s2 + $0x10] sm:$0x1] %v225_v45  ;;  %1359 = vst.sshfl [vmem:[%s2522_s2 + $0x28] sm:$0x1 pattern:$0x73625140] %v196_v42  ;;  %1890 = vmatprep.subr.bf16.mxu1 %v2026_v17 }
 0x113   :  { %v228_v49 = vcombine.high %v224_v46, %v224_v46  ;;  %240 = vst [vmem:[%s2522_s2 + $0x18] sm:$0x1] %v227_v48  ;;  %243 = vst [vmem:[%s2522_s2 + $0x30] sm:$0x1] %v226_v47 }
 0x114   :  { %1892 = vmatpush3.bf16.msra.mxu1 %v2108_v20 }
 0x115   :  { %244 = vst [vmem:[%s2522_s2 + $0x38] sm:$0x1] %v228_v49  ;;  %1893 = vmatprep.subr.bf16.mxu1 %v2026_v17 }
 0x118   :  { %1895 = vmatpush3.bf16.msra.mxu1 %v2114_v21 }
 0x119   :  { %1896 = vmatprep.subr.bf16.mxu1 %v2026_v17 }
 0x11c   :  { %1898 = vmatpush3.bf16.msra.mxu1 %v2120_v22 }
 0x11d   :  { %1899 = vmatprep.subr.bf16.mxu1 %v2026_v17 }
 0x120   :  { %1901 = vmatpush3.bf16.msra.mxu1 %v2126_v23 }
 0x121   :  { %1902 = vmatprep.subr.bf16.mxu1 %v2026_v17 }
 0x124   :  { %1904 = vmatpush3.bf16.msra.mxu1 %v2132_v24 }
 0x125   :  { %1905 = vmatprep.subr.bf16.mxu1 %v2026_v17 }
 0x128   :  { %1907 = vmatpush3.bf16.msra.mxu1 %v2138_v25 }
 0x129   :  { %1932 = vmatprep.subr.bf16.mxu1 %v2026_v17 }
 0x1de   :  { %v329_v51 = vpop.f32.mrb[0].mxu1 }
 0x1df   :  { %v333_v52 = vadd.f32 %v1360_v50, %v329_v51  ;;  %v1601_v53 = vpop.f32.mrb[1].mxu1  ;;  %v1375_v51 = vld [vmem:[%s2520_s0 + $0x20] sm:$0xff] }
 0x1e1   :  { %2010 = vtanh.f32 %v333_v52 }
 0x1eb   :  { %v2011_v54 = vpop.eup %2010 }
 0x1ec   :  { %v336_v55 = vcombine.high %v2011_v54, %v2011_v54  ;;  %v343_v56 = vrot.slane %v2011_v54, %v2169_v35  ;;  %1635 = vmatmul.mubr.f32.vlgmr.msra.gmra.mrb[2].mxu0 %v2011_v54 }
 0x1ed   :  { %1910 = vmatpush3.bf16.msra.mxu0 %v2093_v16  ;;  %1704 = vmatprep.mubr.msk.f32.mxu0 %vm2027_vm0, %v2028_v19 }
 0x1ee   :  { %v350_v57 = vrot.slane %v336_v55, %v2169_v35  ;;  %v351_v58 = vcombine.high %v343_v56, %v343_v56  ;;  %v359_v59 = vrot.slane %v343_v56, %v2169_v35  ;;  %1361 = vst.sshfl [vmem:[%s2522_s2 + $0x1] sm:$0x1 pattern:$0x73625140] %v343_v56  ;;  %1911 = vmatprep.subr.bf16.mxu0 %v2026_v17 }
 0x1f0   :  { %v352_v60 = vcombine.high %v350_v57, %v350_v57  ;;  %v366_v61 = vrot.slane %v350_v57, %v2169_v35  ;;  %v373_v62 = vrot.slane %v351_v58, %v2169_v35  ;;  %v381_v63 = vcombine.high %v359_v59, %v359_v59  ;;  %1362 = vst.sshfl [vmem:[%s2522_s2 + $0x9] sm:$0x1 pattern:$0x73625140] %v351_v58 }
 0x1f1   :  { %1363 = vst.sshfl [vmem:[%s2522_s2 + $0x21] sm:$0x1 pattern:$0x73625140] %v350_v57  ;;  %1913 = vmatpush3.bf16.msra.mxu0 %v2097_v18 }
 0x1f2   :  { %v380_v0 = vrot.slane %v352_v60, %v2169_v35  ;;  %v382_v1 = vcombine.high %v366_v61, %v366_v61  ;;  %v383_v2 = vcombine.high %v373_v62, %v373_v62  ;;  %395 = vst [vmem:[%s2522_s2 + $0x11] sm:$0x1] %v381_v63  ;;  %1364 = vst.sshfl [vmem:[%s2522_s2 + $0x29] sm:$0x1 pattern:$0x73625140] %v352_v60  ;;  %1914 = vmatprep.subr.bf16.mxu0 %v2026_v17 }
 0x1f4   :  { %v384_v3 = vcombine.high %v380_v0, %v380_v0  ;;  %396 = vst [vmem:[%s2522_s2 + $0x19] sm:$0x1] %v383_v2  ;;  %399 = vst [vmem:[%s2522_s2 + $0x31] sm:$0x1] %v382_v1 }
 0x1f5   :  { %1916 = vmatpush3.bf16.msra.mxu0 %v2108_v20 }
 0x1f6   :  { %400 = vst [vmem:[%s2522_s2 + $0x39] sm:$0x1] %v384_v3  ;;  %1917 = vmatprep.subr.bf16.mxu0 %v2026_v17 }
 0x1f9   :  { %1919 = vmatpush3.bf16.msra.mxu0 %v2114_v21 }
 0x1fa   :  { %1920 = vmatprep.subr.bf16.mxu0 %v2026_v17 }
 0x1fd   :  { %1922 = vmatpush3.bf16.msra.mxu0 %v2120_v22 }
 0x1fe   :  { %1923 = vmatprep.subr.bf16.mxu0 %v2026_v17 }
 0x201   :  { %1925 = vmatpush3.bf16.msra.mxu0 %v2126_v23 }
 0x202   :  { %1926 = vmatprep.subr.bf16.mxu0 %v2026_v17 }
 0x205   :  { %1928 = vmatpush3.bf16.msra.mxu0 %v2132_v24 }
 0x206   :  { %1929 = vmatprep.subr.bf16.mxu0 %v2026_v17 }
 0x209   :  { %1931 = vmatpush3.bf16.msra.mxu0 %v2138_v25 }
 0x20a   :  { %1956 = vmatprep.subr.bf16.mxu0 %v2026_v17 }
 0x2bf   :  { %v485_v5 = vpop.f32.mrb[2].mxu0 }
 0x2c0   :  { %v489_v6 = vadd.f32 %v1365_v4, %v485_v5  ;;  %v1636_v7 = vpop.f32.mrb[3].mxu0 }
 0x2c2   :  { %2012 = vtanh.f32 %v489_v6 }
 0x2cc   :  { %v2013_v8 = vpop.eup %2012 }
 0x2cd   :  { %v492_v9 = vcombine.high %v2013_v8, %v2013_v8  ;;  %v499_v10 = vrot.slane %v2013_v8, %v2169_v35  ;;  %1670 = vmatmul.mubr.f32.vlgmr.msra.gmra.mrb[2].mxu1 %v2013_v8 }
 0x2ce   :  { %1934 = vmatpush3.bf16.msra.mxu1 %v2093_v16  ;;  %1739 = vmatprep.mubr.msk.f32.mxu1 %vm2027_vm0, %v2028_v19 }
 0x2cf   :  { %v506_v11 = vrot.slane %v492_v9, %v2169_v35  ;;  %v507_v12 = vcombine.high %v499_v10, %v499_v10  ;;  %v515_v13 = vrot.slane %v499_v10, %v2169_v35  ;;  %1366 = vst.sshfl [vmem:[%s2522_s2 + $0x2] sm:$0x1 pattern:$0x73625140] %v499_v10  ;;  %1935 = vmatprep.subr.bf16.mxu1 %v2026_v17 }
 0x2d1   :  { %v508_v14 = vcombine.high %v506_v11, %v506_v11  ;;  %v522_v15 = vrot.slane %v506_v11, %v2169_v35  ;;  %v529_v26 = vrot.slane %v507_v12, %v2169_v35  ;;  %v537_v27 = vcombine.high %v515_v13, %v515_v13  ;;  %1367 = vst.sshfl [vmem:[%s2522_s2 + $0xa] sm:$0x1 pattern:$0x73625140] %v507_v12  ;;  %v1385_v13 = vld [vmem:[%s2520_s0 + $0x30] sm:$0xff] }
 0x2d2   :  { %1368 = vst.sshfl [vmem:[%s2522_s2 + $0x22] sm:$0x1 pattern:$0x73625140] %v506_v11  ;;  %1937 = vmatpush3.bf16.msra.mxu1 %v2097_v18 }
 0x2d3   :  { %v536_v28 = vrot.slane %v508_v14, %v2169_v35  ;;  %v538_v29 = vcombine.high %v522_v15, %v522_v15  ;;  %v539_v30 = vcombine.high %v529_v26, %v529_v26  ;;  %551 = vst [vmem:[%s2522_s2 + $0x12] sm:$0x1] %v537_v27  ;;  %1369 = vst.sshfl [vmem:[%s2522_s2 + $0x2a] sm:$0x1 pattern:$0x73625140] %v508_v14  ;;  %1938 = vmatprep.subr.bf16.mxu1 %v2026_v17 }
 0x2d5   :  { %v540_v31 = vcombine.high %v536_v28, %v536_v28  ;;  %552 = vst [vmem:[%s2522_s2 + $0x1a] sm:$0x1] %v539_v30  ;;  %555 = vst [vmem:[%s2522_s2 + $0x32] sm:$0x1] %v538_v29 }
 0x2d6   :  { %1940 = vmatpush3.bf16.msra.mxu1 %v2108_v20 }
 0x2d7   :  { %556 = vst [vmem:[%s2522_s2 + $0x3a] sm:$0x1] %v540_v31  ;;  %1941 = vmatprep.subr.bf16.mxu1 %v2026_v17 }
 0x2da   :  { %1943 = vmatpush3.bf16.msra.mxu1 %v2114_v21 }
 0x2db   :  { %1944 = vmatprep.subr.bf16.mxu1 %v2026_v17 }
 0x2de   :  { %1946 = vmatpush3.bf16.msra.mxu1 %v2120_v22 }
 0x2df   :  { %1947 = vmatprep.subr.bf16.mxu1 %v2026_v17 }
 0x2e2   :  { %1949 = vmatpush3.bf16.msra.mxu1 %v2126_v23 }
 0x2e3   :  { %1950 = vmatprep.subr.bf16.mxu1 %v2026_v17 }
 0x2e6   :  { %1952 = vmatpush3.bf16.msra.mxu1 %v2132_v24 }
 0x2e7   :  { %1953 = vmatprep.subr.bf16.mxu1 %v2026_v17 }
 0x2ea   :  { %1955 = vmatpush3.bf16.msra.mxu1 %v2138_v25 }
 0x2eb   :  { %1980 = vmatprep.subr.bf16.mxu1 %v2026_v17 }
 0x3a0   :  { %v641_v33 = vpop.f32.mrb[2].mxu1 }
 0x3a1   :  { %v645_v34 = vadd.f32 %v1370_v32, %v641_v33  ;;  %v1671_v36 = vpop.f32.mrb[3].mxu1 }
 0x3a3   :  { %2014 = vtanh.f32 %v645_v34 }
 0x3ad   :  { %v2015_v37 = vpop.eup %2014 }
 0x3ae   :  { %v648_v38 = vcombine.high %v2015_v37, %v2015_v37  ;;  %v655_v39 = vrot.slane %v2015_v37, %v2169_v35  ;;  %1705 = vmatmul.mubr.f32.vlgmr.msra.gmra.mrb[4].mxu0 %v2015_v37 }
 0x3af   :  { %1958 = vmatpush3.bf16.msra.mxu0 %v2093_v16  ;;  %1774 = vmatprep.mubr.msk.f32.mxu0 %vm2027_vm0, %v2028_v19 }
 0x3b0   :  { %v662_v40 = vrot.slane %v648_v38, %v2169_v35  ;;  %v663_v41 = vcombine.high %v655_v39, %v655_v39  ;;  %v671_v42 = vrot.slane %v655_v39, %v2169_v35  ;;  %1371 = vst.sshfl [vmem:[%s2522_s2 + $0x3] sm:$0x1 pattern:$0x73625140] %v655_v39  ;;  %1959 = vmatprep.subr.bf16.mxu0 %v2026_v17 }
 0x3b2   :  { %v664_v43 = vcombine.high %v662_v40, %v662_v40  ;;  %v678_v44 = vrot.slane %v662_v40, %v2169_v35  ;;  %v685_v45 = vrot.slane %v663_v41, %v2169_v35  ;;  %v693_v46 = vcombine.high %v671_v42, %v671_v42  ;;  %1372 = vst.sshfl [vmem:[%s2522_s2 + $0xb] sm:$0x1 pattern:$0x73625140] %v663_v41  ;;  %v1390_v42 = vld [vmem:[%s2520_s0 + $0x38] sm:$0xff] }
 0x3b3   :  { %1373 = vst.sshfl [vmem:[%s2522_s2 + $0x23] sm:$0x1 pattern:$0x73625140] %v662_v40  ;;  %1961 = vmatpush3.bf16.msra.mxu0 %v2097_v18 }
 0x3b4   :  { %v692_v47 = vrot.slane %v664_v43, %v2169_v35  ;;  %v694_v48 = vcombine.high %v678_v44, %v678_v44  ;;  %v695_v49 = vcombine.high %v685_v45, %v685_v45  ;;  %707 = vst [vmem:[%s2522_s2 + $0x13] sm:$0x1] %v693_v46  ;;  %1374 = vst.sshfl [vmem:[%s2522_s2 + $0x2b] sm:$0x1 pattern:$0x73625140] %v664_v43  ;;  %1962 = vmatprep.subr.bf16.mxu0 %v2026_v17 }
 0x3b6   :  { %v696_v50 = vcombine.high %v692_v47, %v692_v47  ;;  %708 = vst [vmem:[%s2522_s2 + $0x1b] sm:$0x1] %v695_v49  ;;  %711 = vst [vmem:[%s2522_s2 + $0x33] sm:$0x1] %v694_v48 }
 0x3b7   :  { %1964 = vmatpush3.bf16.msra.mxu0 %v2108_v20 }
 0x3b8   :  { %712 = vst [vmem:[%s2522_s2 + $0x3b] sm:$0x1] %v696_v50  ;;  %1965 = vmatprep.subr.bf16.mxu0 %v2026_v17 }
 0x3bb   :  { %1967 = vmatpush3.bf16.msra.mxu0 %v2114_v21 }
 0x3bc   :  { %1968 = vmatprep.subr.bf16.mxu0 %v2026_v17 }
 0x3bf   :  { %1970 = vmatpush3.bf16.msra.mxu0 %v2120_v22 }
 0x3c0   :  { %1971 = vmatprep.subr.bf16.mxu0 %v2026_v17 }
 0x3c3   :  { %1973 = vmatpush3.bf16.msra.mxu0 %v2126_v23 }
 0x3c4   :  { %1974 = vmatprep.subr.bf16.mxu0 %v2026_v17 }
 0x3c7   :  { %1976 = vmatpush3.bf16.msra.mxu0 %v2132_v24 }
 0x3c8   :  { %1977 = vmatprep.subr.bf16.mxu0 %v2026_v17 }
 0x3cb   :  { %1979 = vmatpush3.bf16.msra.mxu0 %v2138_v25 }
 0x481   :  { %v797_v52 = vpop.f32.mrb[4].mxu0 }
 0x482   :  { %v801_v53 = vadd.f32 %v1375_v51, %v797_v52  ;;  %v1706_v54 = vpop.f32.mrb[5].mxu0 }
 0x484   :  { %2016 = vtanh.f32 %v801_v53 }
 0x48e   :  { %v2017_v55 = vpop.eup %2016 }
 0x48f   :  { %v804_v56 = vcombine.high %v2017_v55, %v2017_v55  ;;  %v811_v57 = vrot.slane %v2017_v55, %v2169_v35  ;;  %1740 = vmatmul.mubr.f32.vlgmr.msra.gmra.mrb[4].mxu1 %v2017_v55 }
 0x490   :  { %1982 = vmatpush3.bf16.msra.mxu1 %v2093_v16  ;;  %1809 = vmatprep.mubr.msk.f32.mxu1 %vm2027_vm0, %v2028_v19 }
 0x491   :  { %v818_v58 = vrot.slane %v804_v56, %v2169_v35  ;;  %v819_v59 = vcombine.high %v811_v57, %v811_v57  ;;  %v827_v60 = vrot.slane %v811_v57, %v2169_v35  ;;  %1376 = vst.sshfl [vmem:[%s2522_s2 + $0x4] sm:$0x1 pattern:$0x73625140] %v811_v57  ;;  %1983 = vmatprep.subr.bf16.mxu1 %v2026_v17 }
 0x493   :  { %v820_v61 = vcombine.high %v818_v58, %v818_v58  ;;  %v834_v62 = vrot.slane %v818_v58, %v2169_v35  ;;  %v841_v63 = vrot.slane %v819_v59, %v2169_v35  ;;  %v849_v16 = vcombine.high %v827_v60, %v827_v60  ;;  %1377 = vst.sshfl [vmem:[%s2522_s2 + $0xc] sm:$0x1 pattern:$0x73625140] %v819_v59 }
 0x494   :  { %1378 = vst.sshfl [vmem:[%s2522_s2 + $0x24] sm:$0x1 pattern:$0x73625140] %v818_v58  ;;  %1985 = vmatpush3.bf16.msra.mxu1 %v2097_v18  ;;  %v1380_v18 = vld [vmem:[%s2520_s0 + $0x28] sm:$0xff] }
 0x495   :  { %v848_v19 = vrot.slane %v820_v61, %v2169_v35  ;;  %v850_v0 = vcombine.high %v834_v62, %v834_v62  ;;  %v851_v1 = vcombine.high %v841_v63, %v841_v63  ;;  %863 = vst [vmem:[%s2522_s2 + $0x14] sm:$0x1] %v849_v16  ;;  %1379 = vst.sshfl [vmem:[%s2522_s2 + $0x2c] sm:$0x1 pattern:$0x73625140] %v820_v61  ;;  %1986 = vmatprep.subr.bf16.mxu1 %v2026_v17 }
 0x497   :  { %v852_v2 = vcombine.high %v848_v19, %v848_v19  ;;  %864 = vst [vmem:[%s2522_s2 + $0x1c] sm:$0x1] %v851_v1  ;;  %867 = vst [vmem:[%s2522_s2 + $0x34] sm:$0x1] %v850_v0 }
 0x498   :  { %1988 = vmatpush3.bf16.msra.mxu1 %v2108_v20 }
 0x499   :  { %868 = vst [vmem:[%s2522_s2 + $0x3c] sm:$0x1] %v852_v2  ;;  %1989 = vmatprep.subr.bf16.mxu1 %v2026_v17 }
 0x49c   :  { %1991 = vmatpush3.bf16.msra.mxu1 %v2114_v21 }
 0x49d   :  { %1992 = vmatprep.subr.bf16.mxu1 %v2026_v17 }
 0x4a0   :  { %1994 = vmatpush3.bf16.msra.mxu1 %v2120_v22 }
 0x4a1   :  { %1995 = vmatprep.subr.bf16.mxu1 %v2026_v17 }
 0x4a4   :  { %1997 = vmatpush3.bf16.msra.mxu1 %v2126_v23 }
 0x4a5   :  { %1998 = vmatprep.subr.bf16.mxu1 %v2026_v17 }
 0x4a8   :  { %2000 = vmatpush3.bf16.msra.mxu1 %v2132_v24 }
 0x4a9   :  { %2001 = vmatprep.subr.bf16.mxu1 %v2026_v17 }
 0x4ac   :  { %2003 = vmatpush3.bf16.msra.mxu1 %v2138_v25 }
 0x562   :  { %v953_v20 = vpop.f32.mrb[4].mxu1 }
 0x563   :  { %v957_v21 = vadd.f32 %v1380_v18, %v953_v20  ;;  %v1741_v3 = vpop.f32.mrb[5].mxu1 }
 0x565   :  { %2018 = vtanh.f32 %v957_v21 }
 0x56f   :  { %v2019_v22 = vpop.eup %2018 }
 0x570   :  { %v960_v4 = vcombine.high %v2019_v22, %v2019_v22  ;;  %v967_v23 = vrot.slane %v2019_v22, %v2169_v35  ;;  %1775 = vmatmul.mubr.f32.vlgmr.msra.gmra.mrb[6].mxu0 %v2019_v22 }
 0x572   :  { %v974_v5 = vrot.slane %v960_v4, %v2169_v35  ;;  %v975_v24 = vcombine.high %v967_v23, %v967_v23  ;;  %v983_v17 = vrot.slane %v967_v23, %v2169_v35  ;;  %1381 = vst.sshfl [vmem:[%s2522_s2 + $0x5] sm:$0x1 pattern:$0x73625140] %v967_v23 }
 0x574   :  { %v976_v25 = vcombine.high %v974_v5, %v974_v5  ;;  %v990_v6 = vrot.slane %v974_v5, %v2169_v35  ;;  %v997_v7 = vrot.slane %v975_v24, %v2169_v35  ;;  %v1005_v8 = vcombine.high %v983_v17, %v983_v17  ;;  %1382 = vst.sshfl [vmem:[%s2522_s2 + $0xd] sm:$0x1 pattern:$0x73625140] %v975_v24 }
 0x575   :  { %1383 = vst.sshfl [vmem:[%s2522_s2 + $0x25] sm:$0x1 pattern:$0x73625140] %v974_v5 }
 0x576   :  { %v1004_v9 = vrot.slane %v976_v25, %v2169_v35  ;;  %v1006_v10 = vcombine.high %v990_v6, %v990_v6  ;;  %v1007_v11 = vcombine.high %v997_v7, %v997_v7  ;;  %1019 = vst [vmem:[%s2522_s2 + $0x15] sm:$0x1] %v1005_v8  ;;  %1384 = vst.sshfl [vmem:[%s2522_s2 + $0x2d] sm:$0x1 pattern:$0x73625140] %v976_v25 }
 0x578   :  { %v1008_v12 = vcombine.high %v1004_v9, %v1004_v9  ;;  %1020 = vst [vmem:[%s2522_s2 + $0x1d] sm:$0x1] %v1007_v11  ;;  %1023 = vst [vmem:[%s2522_s2 + $0x35] sm:$0x1] %v1006_v10 }
 0x57a   :  { %1024 = vst [vmem:[%s2522_s2 + $0x3d] sm:$0x1] %v1008_v12 }
 0x643   :  { %v1109_v14 = vpop.f32.mrb[6].mxu0 }
 0x644   :  { %v1113_v15 = vadd.f32 %v1385_v13, %v1109_v14  ;;  %v1776_v26 = vpop.f32.mrb[7].mxu0 }
 0x646   :  { %2020 = vtanh.f32 %v1113_v15 }
 0x650   :  { %v2021_v27 = vpop.eup %2020 }
 0x651   :  { %v1116_v28 = vcombine.high %v2021_v27, %v2021_v27  ;;  %v1123_v29 = vrot.slane %v2021_v27, %v2169_v35  ;;  %1810 = vmatmul.mubr.f32.vlgmr.msra.gmra.mrb[6].mxu1 %v2021_v27 }
 0x653   :  { %v1130_v30 = vrot.slane %v1116_v28, %v2169_v35  ;;  %v1131_v31 = vcombine.high %v1123_v29, %v1123_v29  ;;  %v1139_v32 = vrot.slane %v1123_v29, %v2169_v35  ;;  %1386 = vst.sshfl [vmem:[%s2522_s2 + $0x6] sm:$0x1 pattern:$0x73625140] %v1123_v29 }
 0x655   :  { %v1132_v33 = vcombine.high %v1130_v30, %v1130_v30  ;;  %v1146_v34 = vrot.slane %v1130_v30, %v2169_v35  ;;  %v1153_v36 = vrot.slane %v1131_v31, %v2169_v35  ;;  %v1161_v37 = vcombine.high %v1139_v32, %v1139_v32  ;;  %1387 = vst.sshfl [vmem:[%s2522_s2 + $0xe] sm:$0x1 pattern:$0x73625140] %v1131_v31 }
 0x656   :  { %1388 = vst.sshfl [vmem:[%s2522_s2 + $0x26] sm:$0x1 pattern:$0x73625140] %v1130_v30 }
 0x657   :  { %v1160_v38 = vrot.slane %v1132_v33, %v2169_v35  ;;  %v1162_v39 = vcombine.high %v1146_v34, %v1146_v34  ;;  %v1163_v40 = vcombine.high %v1153_v36, %v1153_v36  ;;  %1175 = vst [vmem:[%s2522_s2 + $0x16] sm:$0x1] %v1161_v37  ;;  %1389 = vst.sshfl [vmem:[%s2522_s2 + $0x2e] sm:$0x1 pattern:$0x73625140] %v1132_v33 }
 0x659   :  { %v1164_v41 = vcombine.high %v1160_v38, %v1160_v38  ;;  %1176 = vst [vmem:[%s2522_s2 + $0x1e] sm:$0x1] %v1163_v40  ;;  %1179 = vst [vmem:[%s2522_s2 + $0x36] sm:$0x1] %v1162_v39 }
 0x65b   :  { %1180 = vst [vmem:[%s2522_s2 + $0x3e] sm:$0x1] %v1164_v41 }
 0x724   :  { %v1265_v43 = vpop.f32.mrb[6].mxu1 }
 0x725   :  { %v1269_v44 = vadd.f32 %v1390_v42, %v1265_v43  ;;  %v1811_v45 = vpop.f32.mrb[7].mxu1 }
 0x727   :  { %2022 = vtanh.f32 %v1269_v44 }
 0x731   :  { %v2023_v46 = vpop.eup %2022 }
 0x732   :  { %v1272_v47 = vcombine.high %v2023_v46, %v2023_v46  ;;  %v1279_v48 = vrot.slane %v2023_v46, %v2169_v35 }
 0x734   :  { %v1286_v49 = vrot.slane %v1272_v47, %v2169_v35  ;;  %v1287_v50 = vcombine.high %v1279_v48, %v1279_v48  ;;  %v1295_v51 = vrot.slane %v1279_v48, %v2169_v35  ;;  %1391 = vst.sshfl [vmem:[%s2522_s2 + $0x7] sm:$0x1 pattern:$0x73625140] %v1279_v48 }
 0x736   :  { %v1288_v52 = vcombine.high %v1286_v49, %v1286_v49  ;;  %v1302_v53 = vrot.slane %v1286_v49, %v2169_v35  ;;  %v1309_v54 = vrot.slane %v1287_v50, %v2169_v35  ;;  %v1317_v55 = vcombine.high %v1295_v51, %v1295_v51  ;;  %1392 = vst.sshfl [vmem:[%s2522_s2 + $0xf] sm:$0x1 pattern:$0x73625140] %v1287_v50 }
 0x737   :  { %1393 = vst.sshfl [vmem:[%s2522_s2 + $0x27] sm:$0x1 pattern:$0x73625140] %v1286_v49 }
 0x738   :  { %v1316_v56 = vrot.slane %v1288_v52, %v2169_v35  ;;  %v1318_v57 = vcombine.high %v1302_v53, %v1302_v53  ;;  %v1319_v58 = vcombine.high %v1309_v54, %v1309_v54  ;;  %1331 = vst [vmem:[%s2522_s2 + $0x17] sm:$0x1] %v1317_v55  ;;  %1394 = vst.sshfl [vmem:[%s2522_s2 + $0x2f] sm:$0x1 pattern:$0x73625140] %v1288_v52 }
 0x73a   :  { %v1320_v59 = vcombine.high %v1316_v56, %v1316_v56  ;;  %1332 = vst [vmem:[%s2522_s2 + $0x1f] sm:$0x1] %v1319_v58  ;;  %1335 = vst [vmem:[%s2522_s2 + $0x37] sm:$0x1] %v1318_v57 }
 0x73c   :  { %1336 = vst [vmem:[%s2522_s2 + $0x3f] sm:$0x1] %v1320_v59 }
 0x73d   :  { %1342 = vsyncmov [#allocation4] }
 0x740   :  { %s1343_s11 = vpop.sfrf %1342 }
 0x741   :  { %p1395_p0 = scmp.ne.s32.totalorder %s1343_s11, 0 }
 0x743   :  { %1347 = shalt.err (%p1395_p0)  }

</bundles_post_ra>
